<compile_context>
chip_gen: v6e
topology: v6e:2x2x1
jax: 0.10.0
libtpu: 0.0.40
codegen_flags: <defaults>
</compile_context>

<pallas_src>
import jax
import jax.numpy as jnp
from jax.experimental import pallas as pl
from jax.experimental.pallas import tpu as pltpu

EPS = 1e-5  # PyTorch BatchNorm2d default eps


def _packed_band_rhs(w_hwio, W, Fh):
    """Fold (H-pack, W, Cin) of a KxK conv into one stacked im2row RHS.

    Lane layout: lane = h_sub*W*C + w*C + c with h_sub in [0, Fh).  For each
    packed-row shift dr in [-DR, DR], B_dr[(hs_in,w_in,ci),(hs_out,w_out,co)] =
    w[dh, dw, ci, co] with dh = Fh*dr + hs_in - hs_out + P and
    dw = w_in - w_out + P (zero outside the kernel support / W boundary).
    Matrices are stacked along rows so a single matmul of contraction depth
    ndr*Fh*W*Cin computes the whole conv.
    """
    K, _, Cin, Cout = w_hwio.shape
    P = (K - 1) // 2
    DR = (P + Fh - 1) // Fh
    drs = list(range(-DR, DR + 1))
    Lin, Lout = Fh * W * Cin, Fh * W * Cout
    mats = []
    for dr in drs:
        m = jnp.zeros((Lin, Lout), w_hwio.dtype)
        for hs_in in range(Fh):
            for hs_out in range(Fh):
                dh = Fh * dr + hs_in - hs_out + P
                if 0 <= dh < K:
                    blk = jnp.zeros((W * Cin, W * Cout), w_hwio.dtype)
                    for dw in range(K):
                        blk = blk + jnp.kron(
                            jnp.eye(W, k=P - dw, dtype=w_hwio.dtype),
                            w_hwio[dh, dw])
                    m = m.at[hs_in * W * Cin:(hs_in + 1) * W * Cin,
                             hs_out * W * Cout:(hs_out + 1) * W * Cout].set(blk)
        mats.append(m)
    return jnp.concatenate(mats, axis=0), len(drs), DR


def _make_kernel(N, H2, L, C, ndr, DR):
    NH2 = N * H2
    inv_count = 1.0 / float(N * H2 * (L // C))   # = 1/(N*H*W), elems per channel

    def kernel(x_ref, rhs1_ref, rhs2_ref, g1_ref, be1_ref, g2_ref, be2_ref,
               o_ref, pad_ref):
        # Zero only the DR packed-row H halos, once; convs overwrite the interior.
        pad_ref[:, :DR, :] = jnp.zeros((N, DR, L), jnp.float32)
        pad_ref[:, DR + H2:, :] = jnp.zeros((N, DR, L), jnp.float32)

        def conv(src2d, rhs_ref):
            # One fused im2row MXU matmul per conv: (NH2, ndr*L) x (ndr*L, L),
            # bf16 operands, f32 accumulate.  Conv bias is omitted: it is
            # exactly cancelled by the training-mode BN mean subtraction below.
            pad_ref[:, DR:DR + H2, :] = src2d.reshape(N, H2, L)
            lhs = jnp.concatenate(
                [pad_ref[:, d:d + H2, :].reshape(NH2, L) for d in range(ndr)],
                axis=-1)
            return jnp.dot(lhs.astype(jnp.bfloat16), rhs_ref[...],
                           preferred_element_type=jnp.float32)

        def batchnorm(y, g_ref, be_ref):
            # Training-mode BN (biased var) over all rows and all lanes sharing
            # a channel (lane % C).  Stats stay in f32: one sublane reduce plus
            # log2(L/C) XLU lane rotate-and-add steps — no MXU, no bmat matmul.
            # TODO(synk): E[y^2]-mean^2 is cancellation-prone; use a two-pass /
            # Welford formulation before scaling to production N*H*W.
            stats = jnp.concatenate(
                [jnp.sum(y, axis=0, keepdims=True),
                 jnp.sum(y * y, axis=0, keepdims=True)], axis=0)   # (2, L)
            shift = C
            while shift < L:               # unrolled at trace time (5 rolls here)
                stats = stats + pltpu.roll(stats, shift, 1)
                shift *= 2
            mean = stats[0:1, :] * inv_count
            var = stats[1:2, :] * inv_count - mean * mean
            scale = g_ref[...] * jax.lax.rsqrt(var + EPS)    # (1, L); rsqrt -> EUP
            off = be_ref[...] - mean * scale
            return y * scale + off                           # 2 VPU ops / element

        h = jnp.maximum(batchnorm(conv(x_ref[...], rhs1_ref), g1_ref, be1_ref), 0.0)
        h = batchnorm(conv(h, rhs2_ref), g2_ref, be2_ref)
        # Residual read straight from x_ref (its HBM buffer is aliased to the
        # output; o_ref is only written here, after the read, so this is safe).
        o_ref[...] = jnp.maximum(h + x_ref[...], 0.0).astype(o_ref.dtype)

    return kernel


def fbank_res_block(x_nhwc, params):
    """x_nhwc: (N, H, W, C) float32 NHWC activations. Returns NHWC float32.

    Assumes in_channels == out_channels and stride == 1 (the only configuration
    under which the PyTorch module type-checks).
    """
    N, H, W, C = x_nhwc.shape

    # Pack Fh consecutive H rows onto the lane axis so the slab lane width is a
    # multiple of 128 (here Fh=2 -> 128 lanes).
    Fh = max(1, 128 // (W * C))
    assert H % Fh == 0, "H must be divisible by the H-packing factor"
    H2, L = H // Fh, Fh * W * C
    assert (L // C) & (L // C - 1) == 0, "Fh*W must be a power of two (roll reduce)"

    # One-time relayout of the (tiny) parameters at the wrapper boundary.
    rhs1, ndr, DR = _packed_band_rhs(params["w1"], W, Fh)
    rhs2, _, _ = _packed_band_rhs(params["w2"], W, Fh)
    rhs1, rhs2 = rhs1.astype(jnp.bfloat16), rhs2.astype(jnp.bfloat16)
    tile_c = lambda v: jnp.tile(v.reshape(1, C), (1, Fh * W))   # lane = j*C + c
    g1, be1 = tile_c(params["g1"]), tile_c(params["be1"])
    g2, be2 = tile_c(params["g2"]), tile_c(params["be2"])

    # Lane-dense activation slab: rows = (n, packed-H), lanes = (h_sub, w, c).
    x_slab = x_nhwc.reshape(N * H2, L)

    kernel = _make_kernel(N, H2, L, C, ndr, DR)
    out2d = pl.pallas_call(
        kernel,
        out_shape=jax.ShapeDtypeStruct((N * H2, L), jnp.float32),
        in_specs=[pl.BlockSpec(memory_space=pltpu.MemorySpace.VMEM)] * 7,
        out_specs=pl.BlockSpec(memory_space=pltpu.MemorySpace.VMEM),
        scratch_shapes=[pltpu.VMEM((N, H2 + 2 * DR, L), jnp.float32)],
        input_output_aliases={0: 0},   # residual input reuses the output HBM buffer
        compiler_params=pltpu.CompilerParams(vmem_limit_bytes=32 * 1024 * 1024),
    )(x_slab, rhs1, rhs2, g1, be1, g2, be2)
    # TODO(synk): for production fbank shapes, tile the (N*H2) rows with a
    # "parallel" grid axis (megacore on v7x, 64 MiB VMEM budget, DMA/compute
    # overlap) via a BN stats-accumulate pass + finalize/apply pass, since BN
    # statistics span the full (N, H, W) extent and cannot be finalized per tile.
    return out2d.reshape(N, H, W, C)


def ref_forward(x, p):
    """Pure-JAX reference (same math as the PyTorch module in training mode)."""
    def conv(src, w, b):
        y = jax.lax.conv_general_dilated(
            src, w, window_strides=(1, 1), padding="SAME",
            dimension_numbers=("NHWC", "HWIO", "NHWC"))
        return y + b.reshape(1, 1, 1, -1)

    def bn(y, g, be):
        mean = y.mean(axis=(0, 1, 2), keepdims=True)
        var = ((y - mean) ** 2).mean(axis=(0, 1, 2), keepdims=True)
        return (y - mean) / jnp.sqrt(var + EPS) * g.reshape(1, 1, 1, -1) \
            + be.reshape(1, 1, 1, -1)

    h = jnp.maximum(bn(conv(x, p["w1"], p["b1"]), p["g1"], p["be1"]), 0.0)
    h = bn(conv(h, p["w2"], p["b2"]), p["g2"], p["be2"])
    return jnp.maximum(h + x, 0.0)


if __name__ == "__main__":
    N, C, H, W, K = 2, 4, 16, 16, 3   # in_channels == out_channels, stride=1
    key = jax.random.PRNGKey(0)
    kx, kw1, kb1, kw2, kb2 = jax.random.split(key, 5)

    # Deterministic synthetic params (Conv2d-style uniform init; BN affine defaults).
    fan_in = C * K * K
    bound = 1.0 / float(fan_in) ** 0.5
    params = dict(
        w1=jax.random.uniform(kw1, (K, K, C, C), jnp.float32, -bound, bound),
        b1=jax.random.uniform(kb1, (1, C), jnp.float32, -bound, bound),
        g1=jnp.ones((1, C), jnp.float32),
        be1=jnp.zeros((1, C), jnp.float32),
        w2=jax.random.uniform(kw2, (K, K, C, C), jnp.float32, -bound, bound),
        b2=jax.random.uniform(kb2, (1, C), jnp.float32, -bound, bound),
        g2=jnp.ones((1, C), jnp.float32),
        be2=jnp.zeros((1, C), jnp.float32),
    )

    # PyTorch-style input is NCHW (2, 4, 16, 16); the kernel consumes NHWC.
    x_nchw = jax.random.normal(kx, (N, C, H, W), jnp.float32)
    x = jnp.transpose(x_nchw, (0, 2, 3, 1))

    out = jax.block_until_ready(fbank_res_block(x, params))

    ref = ref_forward(x, params)   # includes conv biases; BN cancels them exactly
    max_err = float(jnp.max(jnp.abs(out - ref)))
    assert out.shape == (N, H, W, C)
    assert max_err < 5e-2, f"mismatch vs reference: max abs err {max_err}"
    print("KERNEL_OK")
</pallas_src>

<mosaic_0001>
module attributes {stable_mosaic.version = 11 : i64} {
  func.func @kernel(%arg0: memref<16x128xf32, #tpu.memory_space<vmem>>, %arg1: memref<384x128xbf16, #tpu.memory_space<vmem>>, %arg2: memref<384x128xbf16, #tpu.memory_space<vmem>>, %arg3: memref<1x128xf32, #tpu.memory_space<vmem>>, %arg4: memref<1x128xf32, #tpu.memory_space<vmem>>, %arg5: memref<1x128xf32, #tpu.memory_space<vmem>>, %arg6: memref<1x128xf32, #tpu.memory_space<vmem>>, %arg7: memref<16x128xf32, #tpu.memory_space<vmem>>, %arg8: memref<2x10x128xf32, #tpu.memory_space<vmem>>) attributes {dimension_semantics = [], scalar_prefetch = 0 : i64, scratch_operands = 1 : i64, tpu.core_type = #tpu.core_type<tc>} {
    %cst = arith.constant 0.000000e+00 : f32
    %0 = vector.broadcast %cst : f32 to vector<2x1x128xf32>
    %c0 = arith.constant 0 : index
    %c0_0 = arith.constant 0 : index
    %c0_1 = arith.constant 0 : index
    %1 = vector.load %arg8[%c0, %c0_0, %c0_1] : memref<2x10x128xf32, #tpu.memory_space<vmem>>, vector<2x1x128xf32>
    tpu.vector_store %arg8[%c0, %c0_0, %c0_1], %0 {strides = array<i32>} : memref<2x10x128xf32, #tpu.memory_space<vmem>>, vector<2x1x128xf32>,
    %cst_2 = arith.constant 0.000000e+00 : f32
    %2 = vector.broadcast %cst_2 : f32 to vector<2x1x128xf32>
    %c0_3 = arith.constant 0 : index
    %c9 = arith.constant 9 : index
    %c0_4 = arith.constant 0 : index
    %3 = vector.load %arg8[%c0_3, %c9, %c0_4] : memref<2x10x128xf32, #tpu.memory_space<vmem>>, vector<2x1x128xf32>
    tpu.vector_store %arg8[%c0_3, %c9, %c0_4], %2 {strides = array<i32>} : memref<2x10x128xf32, #tpu.memory_space<vmem>>, vector<2x1x128xf32>,
    %c0_5 = arith.constant 0 : index
    %c0_6 = arith.constant 0 : index
    %4 = vector.load %arg0[%c0_5, %c0_6] : memref<16x128xf32, #tpu.memory_space<vmem>>, vector<16x128xf32>
    %5 = vector.shape_cast %4 : vector<16x128xf32> to vector<2x8x128xf32>
    %c0_7 = arith.constant 0 : index
    %c1 = arith.constant 1 : index
    %c0_8 = arith.constant 0 : index
    %6 = vector.load %arg8[%c0_7, %c1, %c0_8] : memref<2x10x128xf32, #tpu.memory_space<vmem>>, vector<2x8x128xf32>
    tpu.vector_store %arg8[%c0_7, %c1, %c0_8], %5 {strides = array<i32>} : memref<2x10x128xf32, #tpu.memory_space<vmem>>, vector<2x8x128xf32>,
    %c0_9 = arith.constant 0 : index
    %c0_10 = arith.constant 0 : index
    %c0_11 = arith.constant 0 : index
    %7 = vector.load %arg8[%c0_9, %c0_10, %c0_11] : memref<2x10x128xf32, #tpu.memory_space<vmem>>, vector<2x8x128xf32>
    %8 = vector.shape_cast %7 : vector<2x8x128xf32> to vector<16x128xf32>
    %c0_12 = arith.constant 0 : index
    %c1_13 = arith.constant 1 : index
    %c0_14 = arith.constant 0 : index
    %9 = vector.load %arg8[%c0_12, %c1_13, %c0_14] : memref<2x10x128xf32, #tpu.memory_space<vmem>>, vector<2x8x128xf32>
    %10 = vector.shape_cast %9 : vector<2x8x128xf32> to vector<16x128xf32>
    %c0_15 = arith.constant 0 : index
    %c2 = arith.constant 2 : index
    %c0_16 = arith.constant 0 : index
    %11 = vector.load %arg8[%c0_15, %c2, %c0_16] : memref<2x10x128xf32, #tpu.memory_space<vmem>>, vector<2x8x128xf32>
    %12 = vector.shape_cast %11 : vector<2x8x128xf32> to vector<16x128xf32>
    %13 = tpu.concatenate %8, %10, %12 in 1 : vector<16x128xf32>, vector<16x128xf32>, vector<16x128xf32> -> vector<16x384xf32>
    %14 = arith.truncf %13 : vector<16x384xf32> to vector<16x384xbf16>
    %c0_17 = arith.constant 0 : index
    %c0_18 = arith.constant 0 : index
    %15 = vector.load %arg1[%c0_17, %c0_18] : memref<384x128xbf16, #tpu.memory_space<vmem>>, vector<384x128xbf16>
    %cst_19 = arith.constant dense<0.000000e+00> : vector<16x128xf32>
    %16 = tpu.matmul %14, %15, %cst_19 {dimension_numbers = #tpu.dot_dimension_numbers<[1], [0], [0], [1], [0, 0, 1, 1], [], []>} : vector<16x384xbf16>, vector<384x128xbf16>, vector<16x128xf32> -> vector<16x128xf32>
    %cst_20 = arith.constant dense<0.000000e+00> : vector<128xf32>
    %17 = vector.multi_reduction <add>, %16, %cst_20 [0] : vector<16x128xf32> to vector<128xf32>
    %18 = vector.shape_cast %17 : vector<128xf32> to vector<1x128xf32>
    %19 = arith.mulf %16, %16 : vector<16x128xf32>
    %cst_21 = arith.constant dense<0.000000e+00> : vector<128xf32>
    %20 = vector.multi_reduction <add>, %19, %cst_21 [0] : vector<16x128xf32> to vector<128xf32>
    %21 = vector.shape_cast %20 : vector<128xf32> to vector<1x128xf32>
    %22 = tpu.concatenate %18, %21 in 0 : vector<1x128xf32>, vector<1x128xf32> -> vector<2x128xf32>
    %c4_i32 = arith.constant 4 : i32
    %23 = tpu.dynamic_rotate %22 by %c4_i32 dim 1 : vector<2x128xf32>, i32 -> vector<2x128xf32>
    %24 = arith.addf %22, %23 : vector<2x128xf32>
    %c8_i32 = arith.constant 8 : i32
    %25 = tpu.dynamic_rotate %24 by %c8_i32 dim 1 : vector<2x128xf32>, i32 -> vector<2x128xf32>
    %26 = arith.addf %24, %25 : vector<2x128xf32>
    %c16_i32 = arith.constant 16 : i32
    %27 = tpu.dynamic_rotate %26 by %c16_i32 dim 1 : vector<2x128xf32>, i32 -> vector<2x128xf32>
    %28 = arith.addf %26, %27 : vector<2x128xf32>
    %c32_i32 = arith.constant 32 : i32
    %29 = tpu.dynamic_rotate %28 by %c32_i32 dim 1 : vector<2x128xf32>, i32 -> vector<2x128xf32>
    %30 = arith.addf %28, %29 : vector<2x128xf32>
    %c64_i32 = arith.constant 64 : i32
    %31 = tpu.dynamic_rotate %30 by %c64_i32 dim 1 : vector<2x128xf32>, i32 -> vector<2x128xf32>
    %32 = arith.addf %30, %31 : vector<2x128xf32>
    %33 = vector.extract_strided_slice %32 {offsets = [0, 0], sizes = [1, 128], strides = [1, 1]} : vector<2x128xf32> to vector<1x128xf32>
    %cst_22 = arith.constant 0.001953125 : f32
    %34 = vector.broadcast %cst_22 : f32 to vector<1x128xf32>
    %35 = arith.mulf %33, %34 : vector<1x128xf32>
    %36 = vector.extract_strided_slice %32 {offsets = [1, 0], sizes = [1, 128], strides = [1, 1]} : vector<2x128xf32> to vector<1x128xf32>
    %cst_23 = arith.constant 0.001953125 : f32
    %37 = vector.broadcast %cst_23 : f32 to vector<1x128xf32>
    %38 = arith.mulf %36, %37 : vector<1x128xf32>
    %39 = arith.mulf %35, %35 : vector<1x128xf32>
    %40 = arith.subf %38, %39 : vector<1x128xf32>
    %c0_24 = arith.constant 0 : index
    %c0_25 = arith.constant 0 : index
    %41 = vector.load %arg3[%c0_24, %c0_25] : memref<1x128xf32, #tpu.memory_space<vmem>>, vector<1x128xf32>
    %cst_26 = arith.constant 9.99999974E-6 : f32
    %42 = vector.broadcast %cst_26 : f32 to vector<1x128xf32>
    %43 = arith.addf %40, %42 : vector<1x128xf32>
    %44 = math.rsqrt %43 : vector<1x128xf32>
    %45 = arith.mulf %41, %44 : vector<1x128xf32>
    %c0_27 = arith.constant 0 : index
    %c0_28 = arith.constant 0 : index
    %46 = vector.load %arg4[%c0_27, %c0_28] : memref<1x128xf32, #tpu.memory_space<vmem>>, vector<1x128xf32>
    %47 = arith.mulf %35, %45 : vector<1x128xf32>
    %48 = arith.subf %46, %47 : vector<1x128xf32>
    %49 = vector.broadcast %45 : vector<1x128xf32> to vector<16x128xf32>
    %50 = arith.mulf %16, %49 : vector<16x128xf32>
    %51 = vector.broadcast %48 : vector<1x128xf32> to vector<16x128xf32>
    %52 = arith.addf %50, %51 : vector<16x128xf32>
    %cst_29 = arith.constant 0.000000e+00 : f32
    %53 = vector.broadcast %cst_29 : f32 to vector<16x128xf32>
    %54 = arith.maximumf %52, %53 : vector<16x128xf32>
    %55 = vector.shape_cast %54 : vector<16x128xf32> to vector<2x8x128xf32>
    %c0_30 = arith.constant 0 : index
    %c1_31 = arith.constant 1 : index
    %c0_32 = arith.constant 0 : index
    %56 = vector.load %arg8[%c0_30, %c1_31, %c0_32] : memref<2x10x128xf32, #tpu.memory_space<vmem>>, vector<2x8x128xf32>
    tpu.vector_store %arg8[%c0_30, %c1_31, %c0_32], %55 {strides = array<i32>} : memref<2x10x128xf32, #tpu.memory_space<vmem>>, vector<2x8x128xf32>,
    %c0_33 = arith.constant 0 : index
    %c0_34 = arith.constant 0 : index
    %c0_35 = arith.constant 0 : index
    %57 = vector.load %arg8[%c0_33, %c0_34, %c0_35] : memref<2x10x128xf32, #tpu.memory_space<vmem>>, vector<2x8x128xf32>
    %58 = vector.shape_cast %57 : vector<2x8x128xf32> to vector<16x128xf32>
    %c0_36 = arith.constant 0 : index
    %c1_37 = arith.constant 1 : index
    %c0_38 = arith.constant 0 : index
    %59 = vector.load %arg8[%c0_36, %c1_37, %c0_38] : memref<2x10x128xf32, #tpu.memory_space<vmem>>, vector<2x8x128xf32>
    %60 = vector.shape_cast %59 : vector<2x8x128xf32> to vector<16x128xf32>
    %c0_39 = arith.constant 0 : index
    %c2_40 = arith.constant 2 : index
    %c0_41 = arith.constant 0 : index
    %61 = vector.load %arg8[%c0_39, %c2_40, %c0_41] : memref<2x10x128xf32, #tpu.memory_space<vmem>>, vector<2x8x128xf32>
    %62 = vector.shape_cast %61 : vector<2x8x128xf32> to vector<16x128xf32>
    %63 = tpu.concatenate %58, %60, %62 in 1 : vector<16x128xf32>, vector<16x128xf32>, vector<16x128xf32> -> vector<16x384xf32>
    %64 = arith.truncf %63 : vector<16x384xf32> to vector<16x384xbf16>
    %c0_42 = arith.constant 0 : index
    %c0_43 = arith.constant 0 : index
    %65 = vector.load %arg2[%c0_42, %c0_43] : memref<384x128xbf16, #tpu.memory_space<vmem>>, vector<384x128xbf16>
    %cst_44 = arith.constant dense<0.000000e+00> : vector<16x128xf32>
    %66 = tpu.matmul %64, %65, %cst_44 {dimension_numbers = #tpu.dot_dimension_numbers<[1], [0], [0], [1], [0, 0, 1, 1], [], []>} : vector<16x384xbf16>, vector<384x128xbf16>, vector<16x128xf32> -> vector<16x128xf32>
    %cst_45 = arith.constant dense<0.000000e+00> : vector<128xf32>
    %67 = vector.multi_reduction <add>, %66, %cst_45 [0] : vector<16x128xf32> to vector<128xf32>
    %68 = vector.shape_cast %67 : vector<128xf32> to vector<1x128xf32>
    %69 = arith.mulf %66, %66 : vector<16x128xf32>
    %cst_46 = arith.constant dense<0.000000e+00> : vector<128xf32>
    %70 = vector.multi_reduction <add>, %69, %cst_46 [0] : vector<16x128xf32> to vector<128xf32>
    %71 = vector.shape_cast %70 : vector<128xf32> to vector<1x128xf32>
    %72 = tpu.concatenate %68, %71 in 0 : vector<1x128xf32>, vector<1x128xf32> -> vector<2x128xf32>
    %c4_i32_47 = arith.constant 4 : i32
    %73 = tpu.dynamic_rotate %72 by %c4_i32_47 dim 1 : vector<2x128xf32>, i32 -> vector<2x128xf32>
    %74 = arith.addf %72, %73 : vector<2x128xf32>
    %c8_i32_48 = arith.constant 8 : i32
    %75 = tpu.dynamic_rotate %74 by %c8_i32_48 dim 1 : vector<2x128xf32>, i32 -> vector<2x128xf32>
    %76 = arith.addf %74, %75 : vector<2x128xf32>
    %c16_i32_49 = arith.constant 16 : i32
    %77 = tpu.dynamic_rotate %76 by %c16_i32_49 dim 1 : vector<2x128xf32>, i32 -> vector<2x128xf32>
    %78 = arith.addf %76, %77 : vector<2x128xf32>
    %c32_i32_50 = arith.constant 32 : i32
    %79 = tpu.dynamic_rotate %78 by %c32_i32_50 dim 1 : vector<2x128xf32>, i32 -> vector<2x128xf32>
    %80 = arith.addf %78, %79 : vector<2x128xf32>
    %c64_i32_51 = arith.constant 64 : i32
    %81 = tpu.dynamic_rotate %80 by %c64_i32_51 dim 1 : vector<2x128xf32>, i32 -> vector<2x128xf32>
    %82 = arith.addf %80, %81 : vector<2x128xf32>
    %83 = vector.extract_strided_slice %82 {offsets = [0, 0], sizes = [1, 128], strides = [1, 1]} : vector<2x128xf32> to vector<1x128xf32>
    %cst_52 = arith.constant 0.001953125 : f32
    %84 = vector.broadcast %cst_52 : f32 to vector<1x128xf32>
    %85 = arith.mulf %83, %84 : vector<1x128xf32>
    %86 = vector.extract_strided_slice %82 {offsets = [1, 0], sizes = [1, 128], strides = [1, 1]} : vector<2x128xf32> to vector<1x128xf32>
    %cst_53 = arith.constant 0.001953125 : f32
    %87 = vector.broadcast %cst_53 : f32 to vector<1x128xf32>
    %88 = arith.mulf %86, %87 : vector<1x128xf32>
    %89 = arith.mulf %85, %85 : vector<1x128xf32>
    %90 = arith.subf %88, %89 : vector<1x128xf32>
    %c0_54 = arith.constant 0 : index
    %c0_55 = arith.constant 0 : index
    %91 = vector.load %arg5[%c0_54, %c0_55] : memref<1x128xf32, #tpu.memory_space<vmem>>, vector<1x128xf32>
    %cst_56 = arith.constant 9.99999974E-6 : f32
    %92 = vector.broadcast %cst_56 : f32 to vector<1x128xf32>
    %93 = arith.addf %90, %92 : vector<1x128xf32>
    %94 = math.rsqrt %93 : vector<1x128xf32>
    %95 = arith.mulf %91, %94 : vector<1x128xf32>
    %c0_57 = arith.constant 0 : index
    %c0_58 = arith.constant 0 : index
    %96 = vector.load %arg6[%c0_57, %c0_58] : memref<1x128xf32, #tpu.memory_space<vmem>>, vector<1x128xf32>
    %97 = arith.mulf %85, %95 : vector<1x128xf32>
    %98 = arith.subf %96, %97 : vector<1x128xf32>
    %99 = vector.broadcast %95 : vector<1x128xf32> to vector<16x128xf32>
    %100 = arith.mulf %66, %99 : vector<16x128xf32>
    %101 = vector.broadcast %98 : vector<1x128xf32> to vector<16x128xf32>
    %102 = arith.addf %100, %101 : vector<16x128xf32>
    %c0_59 = arith.constant 0 : index
    %c0_60 = arith.constant 0 : index
    %103 = vector.load %arg0[%c0_59, %c0_60] : memref<16x128xf32, #tpu.memory_space<vmem>>, vector<16x128xf32>
    %104 = arith.addf %102, %103 : vector<16x128xf32>
    %cst_61 = arith.constant 0.000000e+00 : f32
    %105 = vector.broadcast %cst_61 : f32 to vector<16x128xf32>
    %106 = arith.maximumf %104, %105 : vector<16x128xf32>
    %c0_62 = arith.constant 0 : index
    %c0_63 = arith.constant 0 : index
    %107 = vector.load %arg7[%c0_62, %c0_63] : memref<16x128xf32, #tpu.memory_space<vmem>>, vector<16x128xf32>
    tpu.vector_store %arg7[%c0_62, %c0_63], %106 {strides = array<i32>} : memref<16x128xf32, #tpu.memory_space<vmem>>, vector<16x128xf32>,
    return
  }
}

</mosaic_0001>

<bundles_post_ra>
// kernel: tpu_custom_call.1
= control target key start
LH: loop header
LB: loop body
LE: loop exit
PB: predicated region body
PF: predicated region fallthrough
CT: control target
= control target key end

     0   :  { %12 = vsyncpa [#allocation4], 0  ;;  %s1290_s0 = inlined_call_operand.hbm [shape: f32[16,128], index: 0, kind: input, shape index: {}, may-alias: {0,7}]   ;;  %s1291_s1 = inlined_call_operand.hbm [shape: bf16[384,128], index: 1, kind: input, shape index: {}]   ;;  %s1292_s2 = inlined_call_operand.hbm [shape: bf16[384,128], index: 2, kind: input, shape index: {}]   ;;  %s1293_s3 = inlined_call_operand.vmem [shape: f32[1,128], index: 3, kind: input, shape index: {}]   ;;  %s1294_s4 = inlined_call_operand.vmem [shape: f32[1,128], index: 4, kind: input, shape index: {}]   ;;  %s1295_s5 = inlined_call_operand.vmem [shape: f32[1,128], index: 5, kind: input, shape index: {}]   ;;  %s1296_s6 = inlined_call_operand.vmem [shape: f32[1,128], index: 6, kind: input, shape index: {}]   ;;  %s1297_s7 = inlined_call_operand.hbm [shape: f32[16,128], index: 7, kind: output, shape index: {}, may-alias: {0,7}]  }
   0x1   :  { %13 = vsyncpa [#allocation7], 0 }
   0x2   :  { %14 = vsyncpa [#allocation5], 0  ;;  %s1131_s24 = smov [#allocation6]  }
   0x3   :  { %s32_s25 = sshll.u32 %s1131_s24, 4  ;;  %s33_s25 = int_to_ptr.vmem [resolvable:$true] %s32_s25 }
   0x4   :  { %s1053_s26 = scalar_lea.vmem %s33_s25, 3072  ;;  %p1058_p1 = scmp.lt.s32.totalorder %s33_s25, %s33_s25 }
   0x5   :  { %p1054_p0 = scmp.ne.s32.totalorder %s33_s25, %s1053_s26  ;;  %p1059_p2 = scmp.lt.s32.totalorder %s1053_s26, %s1053_s26 }
   0x7   :  { %p1060_p3 = por %p1059_p2, %p1058_p1 }
   0x9   :  { %p1061_p4 = pnand %p1060_p3, %p1054_p0 }
   0xb   :  { %1064 = shalt.err (!%p1061_p4)
}
   0xc   :  { %s1132_s27 = smov 64   ;;  %s1133_s28 = smov 4  }
   0xd   :  { %38 = dma.hbm_to_vmem [thread:$0]  %s1291_s1, 3072, %s33_s25, [#allocation7], %s1132_s27, %s1132_s27, %s1133_s28  }
   0xe   :  { %s1134_s8 = smov [#allocation3]  }
   0xf   :  { %s20_s9 = sshll.u32 %s1134_s8, 4  ;;  %s21_s9 = int_to_ptr.vmem [resolvable:$true] %s20_s9 }
  0x10   :  { %s1073_s10 = scalar_lea.vmem %s21_s9, 256  ;;  %p1078_p6 = scmp.lt.s32.totalorder %s21_s9, %s21_s9 }
  0x11   :  { %p1074_p5 = scmp.ne.s32.totalorder %s21_s9, %s1073_s10  ;;  %p1079_p7 = scmp.lt.s32.totalorder %s1073_s10, %s1073_s10 }
  0x13   :  { %p1080_p8 = por %p1079_p7, %p1078_p6 }
  0x15   :  { %p1081_p9 = pnand %p1080_p8, %p1074_p5 }
  0x17   :  { %1084 = shalt.err (!%p1081_p9)
}
  0x18   :  { %s1135_s11 = smov 128   ;;  %s1136_s12 = smov 8  }
  0x19   :  { %26 = dma.hbm_to_vmem [thread:$0]  %s1290_s0, 256, %s21_s9, [#allocation4], %s1135_s11, %s1135_s11, %s1136_s12  }
  0x1a   :  { %s1137_s1 = smov [#allocation8]  }
  0x1b   :  { %s44_s15 = sshll.u32 %s1137_s1, 4  ;;  %s45_s15 = int_to_ptr.vmem [resolvable:$true] %s44_s15 }
  0x1c   :  { %s1093_s16 = scalar_lea.vmem %s45_s15, 3072  ;;  %p1098_p11 = scmp.lt.s32.totalorder %s45_s15, %s45_s15 }
  0x1d   :  { %p1094_p10 = scmp.ne.s32.totalorder %s45_s15, %s1093_s16  ;;  %p1099_p12 = scmp.lt.s32.totalorder %s1093_s16, %s1093_s16 }
  0x1f   :  { %p1100_p13 = por %p1099_p12, %p1098_p11 }
  0x21   :  { %p1101_p0 = pnand %p1100_p13, %p1094_p10 }
  0x23   :  { %1104 = shalt.err (!%p1101_p0)
}
  0x24   :  { %50 = dma.hbm_to_vmem [thread:$0]  %s1292_s2, 3072, %s45_s15, [#allocation7], %s1132_s27, %s1132_s27, %s1133_s28  }
  0x25   :  { %1125 = dma.done.wait [#allocation4], 256  }
  0x26   :  { %1126 = vsyncadd [#allocation4], 4294967040 }
  0x27   :  { %1127 = dma.done.wait [#allocation7], 6144  }
  0x28   :  { %1128 = vsyncadd [#allocation7], 4294961152  ;;  %v1138_v0 = vmov 0.0   ;;  %vm1139_vm0 = vmmov 0   ;;  %v993_v1 = vld [vmem:[#allocation6 + $0x78] sm:$0xff]   ;;  %v996_v4 = vld [vmem:[#allocation6 + $0x70] sm:$0xff]  }
  0x29   :  { %940 = vmatprep.subr.bf16.mxu1 %v1138_v0  ;;  %69 = vst [vmem:[#allocation2] sm:$0x1] %v1138_v0  ;;  %70 = vst [vmem:[#allocation2 + $0x10] sm:$0x1] %v1138_v0  ;;  %956 = vmatprep.mubr.msk.bf16.mxu1 %vm1139_vm0, %v1138_v0  ;;  %v994_v2 = vld [vmem:[#allocation6 + $0xb8] sm:$0xff]   ;;  %v997_v5 = vld [vmem:[#allocation6 + $0xb0] sm:$0xff]  }
  0x2a   :  { %71 = vst [vmem:[#allocation2 + $0x9] sm:$0x1] %v1138_v0  ;;  %72 = vst [vmem:[#allocation2 + $0x19] sm:$0x1] %v1138_v0  ;;  %878 = vmatprep.subr.bf16.mxu0 %v993_v1  ;;  %v995_v3 = vld [vmem:[#allocation6 + $0x38] sm:$0xff]   ;;  %941 = vmatpush3.bf16.msra.mxu1 %v994_v2  ;;  %v998_v6 = vld [vmem:[#allocation6 + $0x30] sm:$0xff]  }
  0x2b   :  { %879 = vmatpush3.bf16.msra.mxu0 %v995_v3  ;;  %942 = vmatprep.subr.bf16.mxu1 %v1138_v0  ;;  %v999_v7 = vld [vmem:[#allocation6 + $0x68] sm:$0xff]   ;;  %v1002_v10 = vld [vmem:[#allocation6 + $0x60] sm:$0xff]   ;;  %v1005_v13 = vld [vmem:[#allocation6 + $0x58] sm:$0xff]   ;;  %vm376_vm1 = vcmask 1040384   ;;  %s1140_s0 = smov 16   ;;  %s1141_s2 = smov 32  }
  0x2c   :  { %880 = vmatprep.subr.bf16.mxu0 %v996_v4  ;;  %v1000_v8 = vld [vmem:[#allocation6 + $0xa8] sm:$0xff]   ;;  %v1003_v11 = vld [vmem:[#allocation6 + $0xa0] sm:$0xff]   ;;  %v1006_v14 = vld [vmem:[#allocation6 + $0x98] sm:$0xff]   ;;  %s1143_s25 = smov [#allocation9]  }
  0x2d   :  { %v1001_v9 = vld [vmem:[#allocation6 + $0x28] sm:$0xff]   ;;  %v1004_v12 = vld [vmem:[#allocation6 + $0x20] sm:$0xff]   ;;  %v1007_v15 = vld [vmem:[#allocation6 + $0x18] sm:$0xff]   ;;  %s817_s26 = sshll.u32 %s1143_s25, 4  ;;  %s818_s26 = int_to_ptr.vmem [resolvable:$true] %s817_s26 }
  0x2e   :  { %943 = vmatpush3.bf16.msra.mxu1 %v997_v5  ;;  %v1008_v16 = vld [vmem:[#allocation6 + $0x50] sm:$0xff]   ;;  %v1011_v19 = vld [vmem:[#allocation6 + $0x48] sm:$0xff]   ;;  %v1014_v22 = vld [vmem:[#allocation6 + $0x40] sm:$0xff]   ;;  %p1110_p2 = scmp.lt.s32.totalorder %s818_s26, %s818_s26 }
  0x2f   :  { %881 = vmatpush3.bf16.msra.mxu0 %v998_v6  ;;  %944 = vmatprep.subr.bf16.mxu1 %v1138_v0  ;;  %v1009_v17 = vld [vmem:[#allocation6 + $0x90] sm:$0xff]   ;;  %v1012_v20 = vld [vmem:[#allocation6 + $0x88] sm:$0xff]   ;;  %v1217_v24 = vld [vmem:[#allocation3 + $0x8] sm:$0xff] }
  0x30   :  { %882 = vmatprep.subr.bf16.mxu0 %v999_v7  ;;  %v1010_v18 = vld [vmem:[#allocation6 + $0x10] sm:$0xff]   ;;  %v1013_v21 = vld [vmem:[#allocation6 + $0x8] sm:$0xff]   ;;  %v1015_v25 = vld [vmem:[#allocation6 + $0x80] sm:$0xff]   ;;  %76 = vst [vmem:[#allocation2 + $0x11] sm:$0xff] %v1217_v24 }
  0x31   :  { %v1215_v23 = vld [vmem:[#allocation3] sm:$0xff]  ;;  %v1016_v27 = vld [vmem:[#allocation6] sm:$0xff]  }
  0x32   :  { %945 = vmatpush3.bf16.msra.mxu1 %v1000_v8  ;;  %75 = vst [vmem:[#allocation2 + $0x1] sm:$0xff] %v1215_v23  ;;  %v84_v26 = vpack.c.bf16 %v1217_v24, %v1215_v23  ;;  %v1017_v8 = vld [vmem:[#allocation8 + $0x78] sm:$0xff]  }
  0x33   :  { %883 = vmatpush3.bf16.msra.mxu0 %v1001_v9  ;;  %946 = vmatprep.subr.bf16.mxu1 %v1138_v0  ;;  %v1018_v9 = vld [vmem:[#allocation8 + $0xb8] sm:$0xff]  }
  0x34   :  { %884 = vmatprep.subr.bf16.mxu0 %v1002_v10  ;;  %310 = vmatprep.mubr.bf16.mxu0 %v84_v26  ;;  %v1019_v10 = vld [vmem:[#allocation8 + $0x38] sm:$0xff]   ;;  %v1033_v26 = vld [vmem:[#allocation8 + $0x90] sm:$0xff]  }
  0x36   :  { %947 = vmatpush3.bf16.msra.mxu1 %v1003_v11  ;;  %v1020_v11 = vld [vmem:[#allocation8 + $0x70] sm:$0xff]  }
  0x37   :  { %885 = vmatpush3.bf16.msra.mxu0 %v1004_v12  ;;  %948 = vmatprep.subr.bf16.mxu1 %v1138_v0  ;;  %v82_v29 = vld [vmem:[#allocation2 + $0x12] sm:$0xff]  ;;  %v1021_v12 = vld [vmem:[#allocation8 + $0xb0] sm:$0xff]  }
  0x38   :  { %886 = vmatprep.subr.bf16.mxu0 %v1005_v13  ;;  %v78_v32 = vld [vmem:[#allocation2 + $0x10] sm:$0xff]  ;;  %v1022_v13 = vld [vmem:[#allocation8 + $0x30] sm:$0xff]  }
  0x39   :  { %v81_v28 = vld [vmem:[#allocation2 + $0x2] sm:$0xff] }
  0x3a   :  { %949 = vmatpush3.bf16.msra.mxu1 %v1006_v14  ;;  %v77_v30 = vld [vmem:[#allocation2] sm:$0xff]  ;;  %v85_v31 = vpack.c.bf16 %v82_v29, %v81_v28  ;;  %v1023_v14 = vld [vmem:[#allocation8 + $0x68] sm:$0xff]  }
  0x3b   :  { %887 = vmatpush3.bf16.msra.mxu0 %v1007_v15  ;;  %950 = vmatprep.subr.bf16.mxu1 %v1138_v0  ;;  %v83_v33 = vpack.c.bf16 %v78_v32, %v77_v30  ;;  %v1024_v15 = vld [vmem:[#allocation8 + $0xa8] sm:$0xff]   ;;  %v1039_v32 = vld [vmem:[#allocation8 + $0x80] sm:$0xff]  }
  0x3c   :  { %888 = vmatprep.subr.bf16.mxu0 %v1008_v16  ;;  %v1025_v16 = vld [vmem:[#allocation8 + $0x28] sm:$0xff]  }
  0x3d   :  { %v1035_v28 = vld [vmem:[#allocation8 + $0x48] sm:$0xff]  }
  0x3e   :  { %951 = vmatpush3.bf16.msra.mxu1 %v1009_v17  ;;  %v1026_v17 = vld [vmem:[#allocation8 + $0x60] sm:$0xff]   ;;  %v1036_v29 = vld [vmem:[#allocation8 + $0x88] sm:$0xff]  }
  0x3f   :  { %889 = vmatpush3.bf16.msra.mxu0 %v1010_v18  ;;  %952 = vmatprep.subr.bf16.mxu1 %v1138_v0  ;;  %v1027_v18 = vld [vmem:[#allocation8 + $0xa0] sm:$0xff]   ;;  %v1037_v30 = vld [vmem:[#allocation8 + $0x8] sm:$0xff]  }
  0x40   :  { %890 = vmatprep.subr.bf16.mxu0 %v1011_v19  ;;  %v1028_v19 = vld [vmem:[#allocation8 + $0x20] sm:$0xff]  }
  0x42   :  { %953 = vmatpush3.bf16.msra.mxu1 %v1012_v20  ;;  %v1029_v20 = vld [vmem:[#allocation8 + $0x58] sm:$0xff]  }
  0x43   :  { %891 = vmatpush3.bf16.msra.mxu0 %v1013_v21  ;;  %954 = vmatprep.subr.bf16.mxu1 %v1138_v0  ;;  %v1030_v21 = vld [vmem:[#allocation8 + $0x98] sm:$0xff]  }
  0x44   :  { %892 = vmatprep.subr.bf16.mxu0 %v1014_v22  ;;  %v1031_v22 = vld [vmem:[#allocation8 + $0x18] sm:$0xff]  }
  0x46   :  { %955 = vmatpush3.bf16.msra.mxu1 %v1015_v25  ;;  %v1032_v25 = vld [vmem:[#allocation8 + $0x50] sm:$0xff]  }
  0x47   :  { %893 = vmatpush3.bf16.msra.mxu0 %v1016_v27  ;;  %960 = vmatprep.subr.bf16.mxu1 %v1138_v0  ;;  %v1034_v27 = vld [vmem:[#allocation8 + $0x10] sm:$0xff]  }
  0x48   :  { %909 = vmatprep.subr.bf16.mxu0 %v1017_v8 }
  0x49   :  { %957 = vmatmul.mubr.bf16.vlgmr.msra.gmra.mxu1 %v85_v31  ;;  %v1038_v31 = vld [vmem:[#allocation8 + $0x40] sm:$0xff]  }
  0x4a   :  { %311 = vmatmul.mubr.bf16.vlgmr.msra.gmra.mxu0 %v83_v33  ;;  %976 = vmatprep.mubr.msk.bf16.mxu1 %vm1139_vm0, %v1138_v0  ;;  %v1040_v33 = vld [vmem:[#allocation8] sm:$0xff]  }
  0x4b   :  { %961 = vmatpush3.bf16.msra.mxu1 %v1018_v9  ;;  %910 = vmatpush3.bf16.msra.mxu0 %v1019_v10 }
  0x4c   :  { %962 = vmatprep.subr.bf16.mxu1 %v1138_v0  ;;  %911 = vmatprep.subr.bf16.mxu0 %v1020_v11 }
  0x4f   :  { %963 = vmatpush3.bf16.msra.mxu1 %v1021_v12  ;;  %912 = vmatpush3.bf16.msra.mxu0 %v1022_v13 }
  0x50   :  { %964 = vmatprep.subr.bf16.mxu1 %v1138_v0  ;;  %913 = vmatprep.subr.bf16.mxu0 %v1023_v14 }
  0x53   :  { %965 = vmatpush3.bf16.msra.mxu1 %v1024_v15  ;;  %914 = vmatpush3.bf16.msra.mxu0 %v1025_v16 }
  0x54   :  { %966 = vmatprep.subr.bf16.mxu1 %v1138_v0  ;;  %915 = vmatprep.subr.bf16.mxu0 %v1026_v17 }
  0x57   :  { %967 = vmatpush3.bf16.msra.mxu1 %v1027_v18  ;;  %916 = vmatpush3.bf16.msra.mxu0 %v1028_v19 }
  0x58   :  { %968 = vmatprep.subr.bf16.mxu1 %v1138_v0  ;;  %917 = vmatprep.subr.bf16.mxu0 %v1029_v20 }
  0x5b   :  { %969 = vmatpush3.bf16.msra.mxu1 %v1030_v21  ;;  %918 = vmatpush3.bf16.msra.mxu0 %v1031_v22 }
  0x5c   :  { %970 = vmatprep.subr.bf16.mxu1 %v1138_v0  ;;  %919 = vmatprep.subr.bf16.mxu0 %v1032_v25 }
  0x5f   :  { %971 = vmatpush3.bf16.msra.mxu1 %v1033_v26  ;;  %920 = vmatpush3.bf16.msra.mxu0 %v1034_v27 }
  0x60   :  { %972 = vmatprep.subr.bf16.mxu1 %v1138_v0  ;;  %921 = vmatprep.subr.bf16.mxu0 %v1035_v28 }
  0x63   :  { %973 = vmatpush3.bf16.msra.mxu1 %v1036_v29  ;;  %922 = vmatpush3.bf16.msra.mxu0 %v1037_v30 }
  0x64   :  { %974 = vmatprep.subr.bf16.mxu1 %v1138_v0  ;;  %923 = vmatprep.subr.bf16.mxu0 %v1038_v31 }
  0x67   :  { %975 = vmatpush3.bf16.msra.mxu1 %v1039_v32  ;;  %924 = vmatpush3.bf16.msra.mxu0 %v1040_v33 }
 0x109   :  { %v353_v34 = vpop.f32.mrf.mxu1 }
 0x10a   :  { %v894_v35 = vpop.f32.mrf.mxu0 }
 0x10b   :  { %v958_v36 = vpop.f32.mrf.mxu1 }
 0x10c   :  { %v895_v37 = vpop.f32.mrf.mxu0 }
 0x10d   :  { %v896_v38 = vadd.f32 %v895_v37, %v894_v35  ;;  %v356_v39 = vpop.f32.mrf.mxu1 }
 0x10e   :  { %v897_v40 = vpop.f32.mrf.mxu0 }
 0x10f   :  { %v959_v41 = vpop.f32.mrf.mxu1  ;;  %v1227_v43 = vadd.f32 %v896_v38, %v353_v34 }
 0x110   :  { %v898_v42 = vpop.f32.mrf.mxu0  ;;  %v1142_v41 = vmov 1966171168  }
 0x111   :  { %v899_v44 = vadd.f32 %v898_v42, %v897_v40  ;;  %v367_v46 = vmul.f32 %v1227_v43, %v1227_v43  ;;  %v404_v42 = vunpack.c.l.s4 %v1142_v41 }
 0x113   :  { %v1229_v45 = vadd.f32 %v899_v44, %v356_v39  ;;  %v406_v44 = vlaneseq }
 0x115   :  { %v360_v47 = vadd.f32 %v1229_v45, %v1227_v43  ;;  %v368_v48 = vmul.f32 %v1229_v45, %v1229_v45 }
 0x117   :  { %v361_v49 = vrot.slane %v360_v47, 4  ;;  %v369_v50 = vadd.f32 %v368_v48, %v367_v46  ;;  %v405_v46 = vunpack.c.0.s8 %v404_v42 }
 0x119   :  { %v362_v51 = vadd.f32 %v361_v49, %v360_v47  ;;  %v370_v52 = vrot.slane %v369_v50, 4  ;;  %v407_v47 = vshrl.u32 %v406_v44, 7 }
 0x11b   :  { %v363_v53 = vrot.slane %v362_v51, 2  ;;  %v371_v54 = vadd.f32 %v370_v52, %v369_v50  ;;  %v1250_v48 = vsub.s32 %v405_v46, %v407_v47  ;;  %v1256_v52 = vsub.s32 0, %v407_v47 }
 0x11d   :  { %v364_v55 = vadd.f32 %v363_v53, %v362_v51  ;;  %v372_v56 = vrot.slane %v371_v54, 2  ;;  %v399_v51 = vld [vmem:[%s1293_s3] sm:$0x1] }
 0x11f   :  { %v365_v57 = vrot.slane %v364_v55, 1  ;;  %v373_v58 = vadd.f32 %v372_v56, %v371_v54 }
 0x121   :  { %v374_v59 = vrot.slane %v373_v58, 1  ;;  %v366_v60 = vadd.f32 %v365_v57, %v364_v55  ;;  %v420_v55 = vld [vmem:[%s1294_s4] sm:$0x1] }
 0x123   :  { %v375_v61 = vadd.f32 %v374_v59, %v373_v58 }
 0x125   :  { %v377_v62 = vsel %vm376_vm1, %v366_v60, %v375_v61 }
 0x126   :  { %378 = vrot.lane.b32.xlu0 %v377_v62, %s1133_s28 }
 0x198   :  { %v379_v63 = vpop.permute.xlu0 %378 }
 0x199   :  { %v380_v1 = vadd.f32 %v379_v63, %v377_v62 }
 0x19b   :  { %381 = vrot.lane.b32.xlu0 %v380_v1, %s1136_s12 }
 0x20d   :  { %v382_v2 = vpop.permute.xlu0 %381 }
 0x20e   :  { %v383_v3 = vadd.f32 %v382_v2, %v380_v1 }
 0x210   :  { %384 = vrot.lane.b32.xlu1 %v383_v3, %s1140_s0 }
 0x282   :  { %v385_v4 = vpop.permute.xlu1 %384 }
 0x283   :  { %v386_v5 = vadd.f32 %v385_v4, %v383_v3 }
 0x285   :  { %387 = vrot.lane.b32.xlu1 %v386_v5, %s1141_s2 }
 0x2f7   :  { %v388_v6 = vpop.permute.xlu1 %387 }
 0x2f8   :  { %v389_v7 = vadd.f32 %v388_v6, %v386_v5 }
 0x2fa   :  { %390 = vrot.lane.b32.xlu0 %v389_v7, %s1132_s27 }
 0x36c   :  { %v391_v34 = vpop.permute.xlu0 %390 }
 0x36d   :  { %v392_v35 = vadd.f32 %v391_v34, %v389_v7 }
 0x36f   :  { %v393_v36 = vmul.f32 0.001953125, %v392_v35 }
 0x371   :  { %v394_v37 = vmul.f32 %v393_v36, %v393_v36 }
 0x373   :  { %v396_v38 = vrot.slane %v394_v37, 7 }
 0x375   :  { %v398_v39 = vsub.f32 %v393_v36, %v396_v38 }
 0x377   :  { %v400_v40 = vadd.f32 1e-05, %v398_v39 }
 0x379   :  { %1041 = vrsqrt.f32 %v400_v40 }
 0x386   :  { %v1042_v49 = vpop.eup %1041 }
 0x387   :  { %v409_v0 = vrot.slane %v1042_v49, %v1250_v48 }
 0x389   :  { %v410_v50 = vcombine.high %v409_v0, %v409_v0 }
 0x38b   :  { %v417_v53 = vrot.slane %v410_v50, %v1250_v48 }
 0x38d   :  { %v419_v54 = vmul.f32 %v417_v53, %v399_v51 }
 0x38f   :  { %v421_v56 = vmul.f32 %v419_v54, %v393_v36  ;;  %v427_v57 = vrot.slane %v419_v54, %v1256_v52 }
 0x391   :  { %v422_v58 = vsub.f32 %v420_v55, %v421_v56  ;;  %v429_v59 = vmul.f32 %v427_v57, %v1227_v43  ;;  %v430_v60 = vmul.f32 %v427_v57, %v1229_v45 }
 0x393   :  { %v435_v61 = vrot.slane %v422_v58, %v1256_v52 }
 0x395   :  { %v437_v62 = vadd.f32 %v435_v61, %v429_v59  ;;  %v438_v63 = vadd.f32 %v435_v61, %v430_v60  ;;  %v764_v60 = vld [vmem:[%s1295_s5] sm:$0x1]  ;;  %s1105_s5 = scalar_lea.vmem %s818_s26, 256 }
 0x396   :  { %p1106_p1 = scmp.ne.s32.totalorder %s818_s26, %s1105_s5  ;;  %p1111_p3 = scmp.lt.s32.totalorder %s1105_s5, %s1105_s5 }
 0x397   :  { %v439_v1 = vmax.f32 %v437_v62, 0.0  ;;  %v440_v2 = vmax.f32 %v438_v63, 0.0  ;;  %v785_v63 = vld [vmem:[%s1296_s6] sm:$0x1] }
 0x398   :  { %p1112_p4 = por %p1111_p3, %p1110_p2 }
 0x399   :  { %441 = vst [vmem:[#allocation2 + $0x1] sm:$0xff] %v439_v1  ;;  %442 = vst [vmem:[#allocation2 + $0x11] sm:$0xff] %v440_v2  ;;  %v450_v3 = vpack.c.bf16 %v440_v2, %v439_v1 }
 0x39a   :  { %p1113_p5 = pnand %p1112_p4, %p1106_p1 }
 0x39b   :  { %676 = vmatprep.mubr.bf16.mxu0 %v450_v3 }
 0x3a0   :  { %v447_v4 = vld [vmem:[#allocation2 + $0x2] sm:$0xff]  ;;  %v448_v5 = vld [vmem:[#allocation2 + $0x12] sm:$0xff] }
 0x3a1   :  { %v443_v6 = vld [vmem:[#allocation2] sm:$0xff]  ;;  %v451_v7 = vpack.c.bf16 %v448_v5, %v447_v4  ;;  %v444_v8 = vld [vmem:[#allocation2 + $0x10] sm:$0xff] }
 0x3a2   :  { %v449_v9 = vpack.c.bf16 %v444_v8, %v443_v6 }
 0x3a3   :  { %977 = vmatmul.mubr.bf16.vlgmr.msra.gmra.mxu1 %v451_v7 }
 0x3a4   :  { %677 = vmatmul.mubr.bf16.vlgmr.msra.gmra.mxu0 %v449_v9 }
 0x463   :  { %v719_v43 = vpop.f32.mrf.mxu1 }
 0x464   :  { %v925_v45 = vpop.f32.mrf.mxu0 }
 0x465   :  { %v978_v10 = vpop.f32.mrf.mxu1 }
 0x466   :  { %v926_v11 = vpop.f32.mrf.mxu0 }
 0x467   :  { %v927_v12 = vadd.f32 %v926_v11, %v925_v45  ;;  %v722_v13 = vpop.f32.mrf.mxu1 }
 0x468   :  { %v928_v14 = vpop.f32.mrf.mxu0 }
 0x469   :  { %v979_v15 = vpop.f32.mrf.mxu1  ;;  %v720_v17 = vadd.f32 %v927_v12, %v719_v43 }
 0x46a   :  { %v929_v16 = vpop.f32.mrf.mxu0 }
 0x46b   :  { %v930_v18 = vadd.f32 %v929_v16, %v928_v14  ;;  %v733_v20 = vmul.f32 %v720_v17, %v720_v17 }
 0x46d   :  { %v723_v19 = vadd.f32 %v930_v18, %v722_v13 }
 0x46f   :  { %v726_v21 = vadd.f32 %v723_v19, %v720_v17  ;;  %v734_v22 = vmul.f32 %v723_v19, %v723_v19 }
 0x471   :  { %v727_v25 = vrot.slane %v726_v21, 4  ;;  %v735_v26 = vadd.f32 %v734_v22, %v733_v20 }
 0x473   :  { %v728_v27 = vadd.f32 %v727_v25, %v726_v21  ;;  %v736_v28 = vrot.slane %v735_v26, 4 }
 0x475   :  { %v729_v29 = vrot.slane %v728_v27, 2  ;;  %v737_v30 = vadd.f32 %v736_v28, %v735_v26 }
 0x477   :  { %v730_v31 = vadd.f32 %v729_v29, %v728_v27  ;;  %v738_v32 = vrot.slane %v737_v30, 2 }
 0x479   :  { %v731_v33 = vrot.slane %v730_v31, 1  ;;  %v739_v34 = vadd.f32 %v738_v32, %v737_v30 }
 0x47b   :  { %v740_v35 = vrot.slane %v739_v34, 1  ;;  %v732_v36 = vadd.f32 %v731_v33, %v730_v31 }
 0x47d   :  { %v741_v37 = vadd.f32 %v740_v35, %v739_v34 }
 0x47f   :  { %v742_v38 = vsel %vm376_vm1, %v732_v36, %v741_v37 }
 0x480   :  { %743 = vrot.lane.b32.xlu1 %v742_v38, %s1133_s28 }
 0x4f2   :  { %v744_v39 = vpop.permute.xlu1 %743 }
 0x4f3   :  { %v745_v40 = vadd.f32 %v744_v39, %v742_v38 }
 0x4f5   :  { %746 = vrot.lane.b32.xlu0 %v745_v40, %s1136_s12 }
 0x567   :  { %v747_v41 = vpop.permute.xlu0 %746 }
 0x568   :  { %v748_v42 = vadd.f32 %v747_v41, %v745_v40 }
 0x56a   :  { %749 = vrot.lane.b32.xlu1 %v748_v42, %s1140_s0 }
 0x5dc   :  { %v750_v44 = vpop.permute.xlu1 %749 }
 0x5dd   :  { %v751_v46 = vadd.f32 %v750_v44, %v748_v42 }
 0x5df   :  { %752 = vrot.lane.b32.xlu0 %v751_v46, %s1141_s2 }
 0x651   :  { %v753_v47 = vpop.permute.xlu0 %752 }
 0x652   :  { %v754_v49 = vadd.f32 %v753_v47, %v751_v46 }
 0x654   :  { %755 = vrot.lane.b32.xlu1 %v754_v49, %s1132_s27 }
 0x6c6   :  { %v756_v0 = vpop.permute.xlu1 %755 }
 0x6c7   :  { %v757_v50 = vadd.f32 %v756_v0, %v754_v49 }
 0x6c9   :  { %v758_v51 = vmul.f32 0.001953125, %v757_v50 }
 0x6cb   :  { %v759_v53 = vmul.f32 %v758_v51, %v758_v51 }
 0x6cd   :  { %v761_v54 = vrot.slane %v759_v53, 7 }
 0x6cf   :  { %v763_v55 = vsub.f32 %v758_v51, %v761_v54 }
 0x6d1   :  { %v765_v56 = vadd.f32 1e-05, %v763_v55 }
 0x6d3   :  { %1043 = vrsqrt.f32 %v765_v56 }
 0x6e0   :  { %v1044_v57 = vpop.eup %1043 }
 0x6e1   :  { %v774_v58 = vrot.slane %v1044_v57, %v1250_v48 }
 0x6e3   :  { %v775_v59 = vcombine.high %v774_v58, %v774_v58 }
 0x6e5   :  { %v782_v61 = vrot.slane %v775_v59, %v1250_v48 }
 0x6e7   :  { %v784_v62 = vmul.f32 %v782_v61, %v764_v60 }
 0x6e9   :  { %v786_v1 = vmul.f32 %v784_v62, %v758_v51  ;;  %v792_v2 = vrot.slane %v784_v62, %v1256_v52 }
 0x6eb   :  { %v787_v3 = vsub.f32 %v785_v63, %v786_v1  ;;  %v794_v5 = vmul.f32 %v792_v2, %v720_v17  ;;  %v795_v6 = vmul.f32 %v792_v2, %v723_v19 }
 0x6ed   :  { %v800_v4 = vrot.slane %v787_v3, %v1256_v52 }
 0x6ef   :  { %v802_v7 = vadd.f32 %v800_v4, %v794_v5  ;;  %v803_v8 = vadd.f32 %v800_v4, %v795_v6 }
 0x6f1   :  { %v806_v9 = vadd.f32 %v802_v7, %v1215_v23  ;;  %v807_v48 = vadd.f32 %v803_v8, %v1217_v24 }
 0x6f3   :  { %v808_v43 = vmax.f32 %v806_v9, 0.0  ;;  %v809_v45 = vmax.f32 %v807_v48, 0.0 }
 0x6f5   :  { %810 = vst [vmem:[#allocation9] sm:$0xff] %v808_v43  ;;  %811 = vst [vmem:[#allocation9 + $0x8] sm:$0xff] %v809_v45 }
 0x6f6   :  { %1116 = shalt.err (!%p1113_p5)
}
 0x6f7   :  { %823 = dma.vmem_to_hbm [thread:$0]  %s818_s26, 256, %s1297_s7, [#allocation5], %s1135_s11, %s1135_s11, %s1136_s12  }
 0x6f8   :  { %1129 = dma.done.wait [#allocation5], 256  }
 0x6f9   :  { %1130 = vsyncadd [#allocation5], 4294967040 }
 0x6fa   :  { %827 = vsyncpa [#allocation4], 1 }
 0x6fb   :  { %828 = vsyncpa [#allocation7], 1 }
 0x6fc   :  { %829 = vsyncpa [#allocation5], 1 }

</bundles_post_ra>
